<compile_context>
chip_gen: v5e
topology: v5e:2x2
jax: 0.10.0
libtpu: 0.0.40
codegen_flags: <defaults>
</compile_context>

<pallas_src>
import jax
import jax.numpy as jnp
from jax import lax
from jax.experimental import pallas as pl
from jax.experimental.pallas import tpu as pltpu

_EPS = 1e-4  # eps of GlowTTS attentions.LayerNorm


# ----------------------------------------------------------------------------
# Pallas kernel: forward pass for `block_b` batch elements per grid step.
# ----------------------------------------------------------------------------
def _dp_kernel(x_ref, m_ref, p_ref, w1_ref, w2_ref, out_ref):
    """Channels-on-sublanes / time-on-lanes layout.

    x_ref  : (Bb, Cin, Tp)  pre-masked + pre-padded input, dot dtype (bf16/f32)
    m_ref  : (Bb, 1, T)     float mask
    p_ref  : (Cf, 8)        packed columns [b1|g1|be1|b2|g2|be2|wp|bp], f32
    w1_ref : (Cf, K*Cin)    conv_1 weight, dot dtype
    w2_ref : (Cf, K*Cf)     conv_2 weight, dot dtype
    out_ref: (Bb, 1, T)     f32, lane-dense output
    """
    Bb, _, Tp = x_ref.shape
    T = out_ref.shape[2]
    K = Tp - T + 1          # odd kernel size => Tp = T + 2 * (K // 2)
    pad = K // 2
    Cf = w1_ref.shape[0]
    dot_dtype = w1_ref.dtype

    # Load small operands once; hoisted out of the unrolled per-element loop.
    P = p_ref[...]
    b1, g1, be1 = P[:, 0:1], P[:, 1:2], P[:, 2:3]
    b2, g2, be2 = P[:, 3:4], P[:, 4:5], P[:, 5:6]
    wp_col = P[:, 6:7]                       # (Cf, 1) proj weight
    bp = P[0:1, 7:8]                         # (1, 1)  proj bias
    w1 = w1_ref[...]
    w2 = w2_ref[...]
    zpad = jnp.zeros((Cf, pad), jnp.float32)

    def conv(h_padded, w_mat, bias):
        # im2col: (C, Tp) -> (K*C, T); conv == a single MXU matmul (Cf,K*C)@(K*C,T).
        cols = jnp.concatenate([h_padded[:, k:k + T] for k in range(K)], axis=0)
        return jnp.dot(w_mat, cols.astype(dot_dtype),
                       preferred_element_type=jnp.float32) + bias

    def layer_norm(h, g, be):
        # GlowTTS LayerNorm: normalize over the channel (sublane) axis, eps=1e-4.
        mean = jnp.mean(h, axis=0, keepdims=True)
        var = jnp.mean(jnp.square(h - mean), axis=0, keepdims=True)
        return (h - mean) * lax.rsqrt(var + _EPS) * g + be

    for b in range(Bb):  # static unroll over the per-step batch block
        xe = x_ref[b].astype(jnp.float32)    # (Cin, Tp); already masked + padded
        me = m_ref[b].astype(jnp.float32)    # (1, T)

        # conv_1 -> relu -> norm_1 -> dropout (identity at eval)
        h = conv(xe, w1, b1)                 # (Cf, T), f32
        h = jnp.maximum(h, 0.0)
        h = layer_norm(h, g1, be1)
        # TODO(synk): nn.Dropout is inference-mode identity; no in-kernel RNG dropout.

        # conv_2 -> relu -> norm_2 -> dropout (identity at eval)
        hp = jnp.concatenate([zpad, h * me, zpad], axis=1)   # (Cf, Tp)
        h = conv(hp, w2, b2)
        h = jnp.maximum(h, 0.0)
        h = layer_norm(h, g2, be2)

        # proj (1x1 conv to 1 channel): VPU multiply + channel (sublane) reduce
        # directly yields a lane-dense (1, T) row; then the final mask.
        s = jnp.sum((h * me) * wp_col, axis=0, keepdims=True)   # (1, T)
        out_ref[b] = ((s + bp) * me).astype(out_ref.dtype)


# ----------------------------------------------------------------------------
# Wrapper: PyTorch-layout API  x:(B,Cin,T), x_mask:(B,1,T) -> (B,1,T)
# ----------------------------------------------------------------------------
def duration_predictor(x, x_mask, params, *, block_b=8, dot_dtype=jnp.bfloat16):
    """GlowTTS DurationPredictor forward (inference semantics: dropout=identity).

    `dot_dtype` sets the MXU operand dtype (bf16 recommended on v5e/v6e/v7x);
    accumulation and all elementwise / LayerNorm math stay f32.
    """
    (w1, b1, g1, be1, w2, b2, g2, be2, wp, bp) = params
    B, Cin, T = x.shape
    K = w1.shape[0]
    Cf = w1.shape[2]
    if K % 2 != 1:
        raise ValueError("kernel_size must be odd (PyTorch 'same' padding assumption)")
    pad = K // 2
    Tp = T + 2 * pad

    # (1) Pre-mask + pre-pad along T in HBM; cast MXU operand to dot_dtype
    #     (halves x DMA bytes for bf16).  No in-kernel zero/concat for conv_1.
    xp = jnp.pad(x * x_mask, ((0, 0), (0, 0), (pad, pad))).astype(dot_dtype)
    m = x_mask.astype(jnp.float32)

    # (2) Conv weights as (Cf, K*C) so each conv is a single matmul.
    #     w[k, c, o] -> Wm[o, k*C + c]
    w1m = jnp.transpose(w1, (2, 0, 1)).reshape(Cf, K * Cin).astype(dot_dtype)
    w2m = jnp.transpose(w2, (2, 0, 1)).reshape(Cf, K * Cf).astype(dot_dtype)

    # (3) Pack the 8 small per-channel params into ONE (Cf, 8) operand (one DMA).
    pk = jnp.stack(
        [b1.reshape(-1), g1.reshape(-1), be1.reshape(-1),
         b2.reshape(-1), g2.reshape(-1), be2.reshape(-1),
         wp.reshape(-1), jnp.broadcast_to(bp.reshape(-1), (Cf,))],
        axis=1,
    ).astype(jnp.float32)

    # (4) Process block_b batch elements per grid step; pad B if needed
    #     (padded rows have mask 0 -> output 0, sliced away below).
    block_b = max(1, min(block_b, B))
    Bp = -(-B // block_b) * block_b
    if Bp != B:
        xp = jnp.pad(xp, ((0, Bp - B), (0, 0), (0, 0)))
        m = jnp.pad(m, ((0, Bp - B), (0, 0), (0, 0)))

    out = pl.pallas_call(
        _dp_kernel,
        out_shape=jax.ShapeDtypeStruct((Bp, 1, T), jnp.float32),
        grid_spec=pltpu.PrefetchScalarGridSpec(
            num_scalar_prefetch=0,
            grid=(Bp // block_b,),
            in_specs=[
                pl.BlockSpec((block_b, Cin, Tp), lambda i: (i, 0, 0)),
                pl.BlockSpec((block_b, 1, T), lambda i: (i, 0, 0)),
                pl.BlockSpec((Cf, 8), lambda i: (0, 0)),
                pl.BlockSpec((Cf, K * Cin), lambda i: (0, 0)),
                pl.BlockSpec((Cf, K * Cf), lambda i: (0, 0)),
            ],
            out_specs=pl.BlockSpec((block_b, 1, T), lambda i: (i, 0, 0)),
        ),
        compiler_params=pltpu.CompilerParams(
            dimension_semantics=("parallel",),   # independent batch work: megacore/dual-TC
            vmem_limit_bytes=32 * 1024 * 1024,
        ),
    )(xp, m, pk, w1m, w2m)
    # TODO(synk): for very long T (thousands of frames) tile T across the grid with
    # a (K//2)-row halo instead of holding the whole padded sequence per step.

    return out[:B]  # (B, 1, T) — PyTorch layout, no transposes needed.


# ----------------------------------------------------------------------------
# Plain-JAX reference (PyTorch layout) for the correctness check.
# ----------------------------------------------------------------------------
def duration_predictor_ref(x, x_mask, params):
    (w1, b1, g1, be1, w2, b2, g2, be2, wp, bp) = params
    K = w1.shape[0]
    pad = K // 2

    def conv1d(xin, w_kio, bias):
        w = jnp.transpose(w_kio, (2, 1, 0))  # (Cout, Cin, K)
        y = lax.conv_general_dilated(
            xin, w, window_strides=(1,), padding=[(pad, pad)],
            dimension_numbers=("NCH", "OIH", "NCH"))
        return y + bias.reshape(1, -1, 1)

    def layer_norm(h, g, b):
        mean = jnp.mean(h, axis=1, keepdims=True)
        var = jnp.mean((h - mean) ** 2, axis=1, keepdims=True)
        hn = (h - mean) * lax.rsqrt(var + _EPS)
        return hn * g.reshape(1, -1, 1) + b.reshape(1, -1, 1)

    h = conv1d(x * x_mask, w1, b1.reshape(-1))
    h = jnp.maximum(h, 0.0)
    h = layer_norm(h, g1.reshape(-1), be1.reshape(-1))
    h = conv1d(h * x_mask, w2, b2.reshape(-1))
    h = jnp.maximum(h, 0.0)
    h = layer_norm(h, g2.reshape(-1), be2.reshape(-1))
    out = jnp.einsum("bct,co->bot", h * x_mask, wp) + bp.reshape(1, 1, 1)
    return out * x_mask


if __name__ == "__main__":
    # Module hyperparameters (small, consistent with DurationPredictor.__init__).
    in_channels, filter_channels, kernel_size, p_dropout = 8, 16, 3, 0.1
    B, T = 2, 12

    key = jax.random.PRNGKey(0)
    keys = jax.random.split(key, 12)

    # Deterministic synthetic parameters (shapes match the nn.Module's params).
    w1 = 0.1 * jax.random.normal(keys[0], (kernel_size, in_channels, filter_channels), jnp.float32)
    b1 = 0.1 * jax.random.normal(keys[1], (1, filter_channels), jnp.float32)
    g1 = 1.0 + 0.1 * jax.random.normal(keys[2], (1, filter_channels), jnp.float32)
    be1 = 0.1 * jax.random.normal(keys[3], (1, filter_channels), jnp.float32)
    w2 = 0.1 * jax.random.normal(keys[4], (kernel_size, filter_channels, filter_channels), jnp.float32)
    b2 = 0.1 * jax.random.normal(keys[5], (1, filter_channels), jnp.float32)
    g2 = 1.0 + 0.1 * jax.random.normal(keys[6], (1, filter_channels), jnp.float32)
    be2 = 0.1 * jax.random.normal(keys[7], (1, filter_channels), jnp.float32)
    wp = 0.1 * jax.random.normal(keys[8], (filter_channels, 1), jnp.float32)
    bp = 0.1 * jax.random.normal(keys[9], (1, 1), jnp.float32)
    params = (w1, b1, g1, be1, w2, b2, g2, be2, wp, bp)

    # Inputs in PyTorch layout: x (B, Cin, T), x_mask (B, 1, T).
    x = jax.random.normal(keys[10], (B, in_channels, T), jnp.float32)
    lengths = jnp.array([T, T - 3])
    x_mask = (jnp.arange(T)[None, None, :] < lengths[:, None, None]).astype(jnp.float32)

    ref = jax.block_until_ready(duration_predictor_ref(x, x_mask, params))

    # Tight semantic check with f32 MXU operands.
    out_f32 = jax.block_until_ready(
        duration_predictor(x, x_mask, params, dot_dtype=jnp.float32))
    assert out_f32.shape == (B, 1, T), out_f32.shape
    assert jnp.allclose(out_f32, ref, atol=1e-4, rtol=1e-4), \
        float(jnp.max(jnp.abs(out_f32 - ref)))

    # Perf path (bf16 MXU operands, f32 accumulation + f32 LayerNorm): looser
    # tolerance only accounts for bf16 rounding of the matmul operands.
    out_bf16 = jax.block_until_ready(
        duration_predictor(x, x_mask, params, dot_dtype=jnp.bfloat16))
    assert out_bf16.shape == (B, 1, T), out_bf16.shape
    assert jnp.allclose(out_bf16, ref, atol=2e-2, rtol=2e-2), \
        float(jnp.max(jnp.abs(out_bf16 - ref)))

    print("KERNEL_OK")
</pallas_src>

<mosaic_0001>
module attributes {stable_mosaic.version = 11 : i64} {
  func.func @_dp_kernel(%arg0: i32, %arg1: memref<2x8x14xf32, #tpu.memory_space<vmem>>, %arg2: memref<2x1x12xf32, #tpu.memory_space<vmem>>, %arg3: memref<16x8xf32, #tpu.memory_space<vmem>>, %arg4: memref<16x24xf32, #tpu.memory_space<vmem>>, %arg5: memref<16x48xf32, #tpu.memory_space<vmem>>, %arg6: memref<2x1x12xf32, #tpu.memory_space<vmem>>) attributes {dimension_semantics = [#tpu.dimension_semantics<parallel>], iteration_bounds = array<i64: 1>, scalar_prefetch = 0 : i64, scratch_operands = 0 : i64, tpu.core_type = #tpu.core_type<tc>, window_params = [{transform_indices = @transform_0, window_bounds = array<i64: 2, 8, 14>}, {transform_indices = @transform_1, window_bounds = array<i64: 2, 1, 12>}, {pipeline_mode = #tpu.pipeline_mode<synchronous>, transform_indices = @transform_2, window_bounds = array<i64: 16, 8>}, {pipeline_mode = #tpu.pipeline_mode<synchronous>, transform_indices = @transform_3, window_bounds = array<i64: 16, 24>}, {pipeline_mode = #tpu.pipeline_mode<synchronous>, transform_indices = @transform_4, window_bounds = array<i64: 16, 48>}, {transform_indices = @transform_5, window_bounds = array<i64: 2, 1, 12>}]} {
    %c0 = arith.constant 0 : index
    %c0_0 = arith.constant 0 : index
    %0 = vector.load %arg3[%c0, %c0_0] : memref<16x8xf32, #tpu.memory_space<vmem>>, vector<16x8xf32>
    %1 = vector.extract_strided_slice %0 {offsets = [0, 0], sizes = [16, 1], strides = [1, 1]} : vector<16x8xf32> to vector<16x1xf32>
    %2 = vector.extract_strided_slice %0 {offsets = [0, 1], sizes = [16, 1], strides = [1, 1]} : vector<16x8xf32> to vector<16x1xf32>
    %3 = vector.extract_strided_slice %0 {offsets = [0, 2], sizes = [16, 1], strides = [1, 1]} : vector<16x8xf32> to vector<16x1xf32>
    %4 = vector.extract_strided_slice %0 {offsets = [0, 3], sizes = [16, 1], strides = [1, 1]} : vector<16x8xf32> to vector<16x1xf32>
    %5 = vector.extract_strided_slice %0 {offsets = [0, 4], sizes = [16, 1], strides = [1, 1]} : vector<16x8xf32> to vector<16x1xf32>
    %6 = vector.extract_strided_slice %0 {offsets = [0, 5], sizes = [16, 1], strides = [1, 1]} : vector<16x8xf32> to vector<16x1xf32>
    %7 = vector.extract_strided_slice %0 {offsets = [0, 6], sizes = [16, 1], strides = [1, 1]} : vector<16x8xf32> to vector<16x1xf32>
    %8 = vector.extract_strided_slice %0 {offsets = [0, 7], sizes = [1, 1], strides = [1, 1]} : vector<16x8xf32> to vector<1x1xf32>
    %c0_1 = arith.constant 0 : index
    %c0_2 = arith.constant 0 : index
    %9 = vector.load %arg4[%c0_1, %c0_2] : memref<16x24xf32, #tpu.memory_space<vmem>>, vector<16x24xf32>
    %c0_3 = arith.constant 0 : index
    %c0_4 = arith.constant 0 : index
    %10 = vector.load %arg5[%c0_3, %c0_4] : memref<16x48xf32, #tpu.memory_space<vmem>>, vector<16x48xf32>
    %cst = arith.constant 0.000000e+00 : f32
    %11 = vector.broadcast %cst : f32 to vector<16x1xf32>
    %c0_5 = arith.constant 0 : index
    %c0_6 = arith.constant 0 : index
    %c0_7 = arith.constant 0 : index
    %12 = vector.load %arg1[%c0_5, %c0_6, %c0_7] : memref<2x8x14xf32, #tpu.memory_space<vmem>>, vector<1x8x14xf32>
    %13 = vector.shape_cast %12 : vector<1x8x14xf32> to vector<8x14xf32>
    %c0_8 = arith.constant 0 : index
    %c0_9 = arith.constant 0 : index
    %c0_10 = arith.constant 0 : index
    %14 = vector.load %arg2[%c0_8, %c0_9, %c0_10] : memref<2x1x12xf32, #tpu.memory_space<vmem>>, vector<1x1x12xf32>
    %15 = vector.shape_cast %14 : vector<1x1x12xf32> to vector<1x12xf32>
    %16 = vector.extract_strided_slice %13 {offsets = [0, 0], sizes = [8, 12], strides = [1, 1]} : vector<8x14xf32> to vector<8x12xf32>
    %17 = vector.extract_strided_slice %13 {offsets = [0, 1], sizes = [8, 12], strides = [1, 1]} : vector<8x14xf32> to vector<8x12xf32>
    %18 = vector.extract_strided_slice %13 {offsets = [0, 2], sizes = [8, 12], strides = [1, 1]} : vector<8x14xf32> to vector<8x12xf32>
    %19 = tpu.concatenate %16, %17, %18 in 0 : vector<8x12xf32>, vector<8x12xf32>, vector<8x12xf32> -> vector<24x12xf32>
    %cst_11 = arith.constant dense<0.000000e+00> : vector<16x12xf32>
    %20 = tpu.matmul %9, %19, %cst_11 {dimension_numbers = #tpu.dot_dimension_numbers<[1], [0], [0], [1], [0, 0, 1, 1], [], []>} : vector<16x24xf32>, vector<24x12xf32>, vector<16x12xf32> -> vector<16x12xf32>
    %21 = vector.broadcast %1 : vector<16x1xf32> to vector<16x12xf32>
    %22 = arith.addf %20, %21 : vector<16x12xf32>
    %cst_12 = arith.constant 0.000000e+00 : f32
    %23 = vector.broadcast %cst_12 : f32 to vector<16x12xf32>
    %24 = arith.maximumf %22, %23 : vector<16x12xf32>
    %cst_13 = arith.constant dense<0.000000e+00> : vector<12xf32>
    %25 = vector.multi_reduction <add>, %24, %cst_13 [0] : vector<16x12xf32> to vector<12xf32>
    %26 = vector.shape_cast %25 : vector<12xf32> to vector<1x12xf32>
    %cst_14 = arith.constant 1.600000e+01 : f32
    %27 = vector.broadcast %cst_14 : f32 to vector<1x12xf32>
    %28 = arith.divf %26, %27 : vector<1x12xf32>
    %29 = vector.broadcast %28 : vector<1x12xf32> to vector<16x12xf32>
    %30 = arith.subf %24, %29 : vector<16x12xf32>
    %31 = arith.mulf %30, %30 : vector<16x12xf32>
    %cst_15 = arith.constant dense<0.000000e+00> : vector<12xf32>
    %32 = vector.multi_reduction <add>, %31, %cst_15 [0] : vector<16x12xf32> to vector<12xf32>
    %33 = vector.shape_cast %32 : vector<12xf32> to vector<1x12xf32>
    %cst_16 = arith.constant 1.600000e+01 : f32
    %34 = vector.broadcast %cst_16 : f32 to vector<1x12xf32>
    %35 = arith.divf %33, %34 : vector<1x12xf32>
    %36 = vector.broadcast %28 : vector<1x12xf32> to vector<16x12xf32>
    %37 = arith.subf %24, %36 : vector<16x12xf32>
    %cst_17 = arith.constant 9.99999974E-5 : f32
    %38 = vector.broadcast %cst_17 : f32 to vector<1x12xf32>
    %39 = arith.addf %35, %38 : vector<1x12xf32>
    %40 = math.rsqrt %39 : vector<1x12xf32>
    %41 = vector.broadcast %40 : vector<1x12xf32> to vector<16x12xf32>
    %42 = arith.mulf %37, %41 : vector<16x12xf32>
    %43 = vector.broadcast %2 : vector<16x1xf32> to vector<16x12xf32>
    %44 = arith.mulf %42, %43 : vector<16x12xf32>
    %45 = vector.broadcast %3 : vector<16x1xf32> to vector<16x12xf32>
    %46 = arith.addf %44, %45 : vector<16x12xf32>
    %47 = vector.broadcast %15 : vector<1x12xf32> to vector<16x12xf32>
    %48 = arith.mulf %46, %47 : vector<16x12xf32>
    %49 = tpu.concatenate %11, %48, %11 in 1 : vector<16x1xf32>, vector<16x12xf32>, vector<16x1xf32> -> vector<16x14xf32>
    %50 = vector.extract_strided_slice %49 {offsets = [0, 0], sizes = [16, 12], strides = [1, 1]} : vector<16x14xf32> to vector<16x12xf32>
    %51 = vector.extract_strided_slice %49 {offsets = [0, 1], sizes = [16, 12], strides = [1, 1]} : vector<16x14xf32> to vector<16x12xf32>
    %52 = vector.extract_strided_slice %49 {offsets = [0, 2], sizes = [16, 12], strides = [1, 1]} : vector<16x14xf32> to vector<16x12xf32>
    %53 = tpu.concatenate %50, %51, %52 in 0 : vector<16x12xf32>, vector<16x12xf32>, vector<16x12xf32> -> vector<48x12xf32>
    %cst_18 = arith.constant dense<0.000000e+00> : vector<16x12xf32>
    %54 = tpu.matmul %10, %53, %cst_18 {dimension_numbers = #tpu.dot_dimension_numbers<[1], [0], [0], [1], [0, 0, 1, 1], [], []>} : vector<16x48xf32>, vector<48x12xf32>, vector<16x12xf32> -> vector<16x12xf32>
    %55 = vector.broadcast %4 : vector<16x1xf32> to vector<16x12xf32>
    %56 = arith.addf %54, %55 : vector<16x12xf32>
    %cst_19 = arith.constant 0.000000e+00 : f32
    %57 = vector.broadcast %cst_19 : f32 to vector<16x12xf32>
    %58 = arith.maximumf %56, %57 : vector<16x12xf32>
    %cst_20 = arith.constant dense<0.000000e+00> : vector<12xf32>
    %59 = vector.multi_reduction <add>, %58, %cst_20 [0] : vector<16x12xf32> to vector<12xf32>
    %60 = vector.shape_cast %59 : vector<12xf32> to vector<1x12xf32>
    %cst_21 = arith.constant 1.600000e+01 : f32
    %61 = vector.broadcast %cst_21 : f32 to vector<1x12xf32>
    %62 = arith.divf %60, %61 : vector<1x12xf32>
    %63 = vector.broadcast %62 : vector<1x12xf32> to vector<16x12xf32>
    %64 = arith.subf %58, %63 : vector<16x12xf32>
    %65 = arith.mulf %64, %64 : vector<16x12xf32>
    %cst_22 = arith.constant dense<0.000000e+00> : vector<12xf32>
    %66 = vector.multi_reduction <add>, %65, %cst_22 [0] : vector<16x12xf32> to vector<12xf32>
    %67 = vector.shape_cast %66 : vector<12xf32> to vector<1x12xf32>
    %cst_23 = arith.constant 1.600000e+01 : f32
    %68 = vector.broadcast %cst_23 : f32 to vector<1x12xf32>
    %69 = arith.divf %67, %68 : vector<1x12xf32>
    %70 = vector.broadcast %62 : vector<1x12xf32> to vector<16x12xf32>
    %71 = arith.subf %58, %70 : vector<16x12xf32>
    %cst_24 = arith.constant 9.99999974E-5 : f32
    %72 = vector.broadcast %cst_24 : f32 to vector<1x12xf32>
    %73 = arith.addf %69, %72 : vector<1x12xf32>
    %74 = math.rsqrt %73 : vector<1x12xf32>
    %75 = vector.broadcast %74 : vector<1x12xf32> to vector<16x12xf32>
    %76 = arith.mulf %71, %75 : vector<16x12xf32>
    %77 = vector.broadcast %5 : vector<16x1xf32> to vector<16x12xf32>
    %78 = arith.mulf %76, %77 : vector<16x12xf32>
    %79 = vector.broadcast %6 : vector<16x1xf32> to vector<16x12xf32>
    %80 = arith.addf %78, %79 : vector<16x12xf32>
    %81 = vector.broadcast %15 : vector<1x12xf32> to vector<16x12xf32>
    %82 = arith.mulf %80, %81 : vector<16x12xf32>
    %83 = vector.broadcast %7 : vector<16x1xf32> to vector<16x12xf32>
    %84 = arith.mulf %82, %83 : vector<16x12xf32>
    %cst_25 = arith.constant dense<0.000000e+00> : vector<12xf32>
    %85 = vector.multi_reduction <add>, %84, %cst_25 [0] : vector<16x12xf32> to vector<12xf32>
    %86 = vector.shape_cast %85 : vector<12xf32> to vector<1x12xf32>
    %87 = vector.broadcast %8 : vector<1x1xf32> to vector<1x12xf32>
    %88 = arith.addf %86, %87 : vector<1x12xf32>
    %89 = arith.mulf %88, %15 : vector<1x12xf32>
    %c0_26 = arith.constant 0 : index
    %c0_27 = arith.constant 0 : index
    %c0_28 = arith.constant 0 : index
    %90 = vector.load %arg6[%c0_26, %c0_27, %c0_28] : memref<2x1x12xf32, #tpu.memory_space<vmem>>, vector<1x1x12xf32>
    %91 = vector.shape_cast %90 : vector<1x1x12xf32> to vector<1x12xf32>
    %92 = vector.shape_cast %89 : vector<1x12xf32> to vector<1x1x12xf32>
    tpu.vector_store %arg6[%c0_26, %c0_27, %c0_28], %92 {strides = array<i32>} : memref<2x1x12xf32, #tpu.memory_space<vmem>>, vector<1x1x12xf32>,
    %c1 = arith.constant 1 : index
    %c0_29 = arith.constant 0 : index
    %c0_30 = arith.constant 0 : index
    %93 = vector.load %arg1[%c1, %c0_29, %c0_30] : memref<2x8x14xf32, #tpu.memory_space<vmem>>, vector<1x8x14xf32>
    %94 = vector.shape_cast %93 : vector<1x8x14xf32> to vector<8x14xf32>
    %c1_31 = arith.constant 1 : index
    %c0_32 = arith.constant 0 : index
    %c0_33 = arith.constant 0 : index
    %95 = vector.load %arg2[%c1_31, %c0_32, %c0_33] : memref<2x1x12xf32, #tpu.memory_space<vmem>>, vector<1x1x12xf32>
    %96 = vector.shape_cast %95 : vector<1x1x12xf32> to vector<1x12xf32>
    %97 = vector.extract_strided_slice %94 {offsets = [0, 0], sizes = [8, 12], strides = [1, 1]} : vector<8x14xf32> to vector<8x12xf32>
    %98 = vector.extract_strided_slice %94 {offsets = [0, 1], sizes = [8, 12], strides = [1, 1]} : vector<8x14xf32> to vector<8x12xf32>
    %99 = vector.extract_strided_slice %94 {offsets = [0, 2], sizes = [8, 12], strides = [1, 1]} : vector<8x14xf32> to vector<8x12xf32>
    %100 = tpu.concatenate %97, %98, %99 in 0 : vector<8x12xf32>, vector<8x12xf32>, vector<8x12xf32> -> vector<24x12xf32>
    %cst_34 = arith.constant dense<0.000000e+00> : vector<16x12xf32>
    %101 = tpu.matmul %9, %100, %cst_34 {dimension_numbers = #tpu.dot_dimension_numbers<[1], [0], [0], [1], [0, 0, 1, 1], [], []>} : vector<16x24xf32>, vector<24x12xf32>, vector<16x12xf32> -> vector<16x12xf32>
    %102 = vector.broadcast %1 : vector<16x1xf32> to vector<16x12xf32>
    %103 = arith.addf %101, %102 : vector<16x12xf32>
    %cst_35 = arith.constant 0.000000e+00 : f32
    %104 = vector.broadcast %cst_35 : f32 to vector<16x12xf32>
    %105 = arith.maximumf %103, %104 : vector<16x12xf32>
    %cst_36 = arith.constant dense<0.000000e+00> : vector<12xf32>
    %106 = vector.multi_reduction <add>, %105, %cst_36 [0] : vector<16x12xf32> to vector<12xf32>
    %107 = vector.shape_cast %106 : vector<12xf32> to vector<1x12xf32>
    %cst_37 = arith.constant 1.600000e+01 : f32
    %108 = vector.broadcast %cst_37 : f32 to vector<1x12xf32>
    %109 = arith.divf %107, %108 : vector<1x12xf32>
    %110 = vector.broadcast %109 : vector<1x12xf32> to vector<16x12xf32>
    %111 = arith.subf %105, %110 : vector<16x12xf32>
    %112 = arith.mulf %111, %111 : vector<16x12xf32>
    %cst_38 = arith.constant dense<0.000000e+00> : vector<12xf32>
    %113 = vector.multi_reduction <add>, %112, %cst_38 [0] : vector<16x12xf32> to vector<12xf32>
    %114 = vector.shape_cast %113 : vector<12xf32> to vector<1x12xf32>
    %cst_39 = arith.constant 1.600000e+01 : f32
    %115 = vector.broadcast %cst_39 : f32 to vector<1x12xf32>
    %116 = arith.divf %114, %115 : vector<1x12xf32>
    %117 = vector.broadcast %109 : vector<1x12xf32> to vector<16x12xf32>
    %118 = arith.subf %105, %117 : vector<16x12xf32>
    %cst_40 = arith.constant 9.99999974E-5 : f32
    %119 = vector.broadcast %cst_40 : f32 to vector<1x12xf32>
    %120 = arith.addf %116, %119 : vector<1x12xf32>
    %121 = math.rsqrt %120 : vector<1x12xf32>
    %122 = vector.broadcast %121 : vector<1x12xf32> to vector<16x12xf32>
    %123 = arith.mulf %118, %122 : vector<16x12xf32>
    %124 = vector.broadcast %2 : vector<16x1xf32> to vector<16x12xf32>
    %125 = arith.mulf %123, %124 : vector<16x12xf32>
    %126 = vector.broadcast %3 : vector<16x1xf32> to vector<16x12xf32>
    %127 = arith.addf %125, %126 : vector<16x12xf32>
    %128 = vector.broadcast %96 : vector<1x12xf32> to vector<16x12xf32>
    %129 = arith.mulf %127, %128 : vector<16x12xf32>
    %130 = tpu.concatenate %11, %129, %11 in 1 : vector<16x1xf32>, vector<16x12xf32>, vector<16x1xf32> -> vector<16x14xf32>
    %131 = vector.extract_strided_slice %130 {offsets = [0, 0], sizes = [16, 12], strides = [1, 1]} : vector<16x14xf32> to vector<16x12xf32>
    %132 = vector.extract_strided_slice %130 {offsets = [0, 1], sizes = [16, 12], strides = [1, 1]} : vector<16x14xf32> to vector<16x12xf32>
    %133 = vector.extract_strided_slice %130 {offsets = [0, 2], sizes = [16, 12], strides = [1, 1]} : vector<16x14xf32> to vector<16x12xf32>
    %134 = tpu.concatenate %131, %132, %133 in 0 : vector<16x12xf32>, vector<16x12xf32>, vector<16x12xf32> -> vector<48x12xf32>
    %cst_41 = arith.constant dense<0.000000e+00> : vector<16x12xf32>
    %135 = tpu.matmul %10, %134, %cst_41 {dimension_numbers = #tpu.dot_dimension_numbers<[1], [0], [0], [1], [0, 0, 1, 1], [], []>} : vector<16x48xf32>, vector<48x12xf32>, vector<16x12xf32> -> vector<16x12xf32>
    %136 = vector.broadcast %4 : vector<16x1xf32> to vector<16x12xf32>
    %137 = arith.addf %135, %136 : vector<16x12xf32>
    %cst_42 = arith.constant 0.000000e+00 : f32
    %138 = vector.broadcast %cst_42 : f32 to vector<16x12xf32>
    %139 = arith.maximumf %137, %138 : vector<16x12xf32>
    %cst_43 = arith.constant dense<0.000000e+00> : vector<12xf32>
    %140 = vector.multi_reduction <add>, %139, %cst_43 [0] : vector<16x12xf32> to vector<12xf32>
    %141 = vector.shape_cast %140 : vector<12xf32> to vector<1x12xf32>
    %cst_44 = arith.constant 1.600000e+01 : f32
    %142 = vector.broadcast %cst_44 : f32 to vector<1x12xf32>
    %143 = arith.divf %141, %142 : vector<1x12xf32>
    %144 = vector.broadcast %143 : vector<1x12xf32> to vector<16x12xf32>
    %145 = arith.subf %139, %144 : vector<16x12xf32>
    %146 = arith.mulf %145, %145 : vector<16x12xf32>
    %cst_45 = arith.constant dense<0.000000e+00> : vector<12xf32>
    %147 = vector.multi_reduction <add>, %146, %cst_45 [0] : vector<16x12xf32> to vector<12xf32>
    %148 = vector.shape_cast %147 : vector<12xf32> to vector<1x12xf32>
    %cst_46 = arith.constant 1.600000e+01 : f32
    %149 = vector.broadcast %cst_46 : f32 to vector<1x12xf32>
    %150 = arith.divf %148, %149 : vector<1x12xf32>
    %151 = vector.broadcast %143 : vector<1x12xf32> to vector<16x12xf32>
    %152 = arith.subf %139, %151 : vector<16x12xf32>
    %cst_47 = arith.constant 9.99999974E-5 : f32
    %153 = vector.broadcast %cst_47 : f32 to vector<1x12xf32>
    %154 = arith.addf %150, %153 : vector<1x12xf32>
    %155 = math.rsqrt %154 : vector<1x12xf32>
    %156 = vector.broadcast %155 : vector<1x12xf32> to vector<16x12xf32>
    %157 = arith.mulf %152, %156 : vector<16x12xf32>
    %158 = vector.broadcast %5 : vector<16x1xf32> to vector<16x12xf32>
    %159 = arith.mulf %157, %158 : vector<16x12xf32>
    %160 = vector.broadcast %6 : vector<16x1xf32> to vector<16x12xf32>
    %161 = arith.addf %159, %160 : vector<16x12xf32>
    %162 = vector.broadcast %96 : vector<1x12xf32> to vector<16x12xf32>
    %163 = arith.mulf %161, %162 : vector<16x12xf32>
    %164 = vector.broadcast %7 : vector<16x1xf32> to vector<16x12xf32>
    %165 = arith.mulf %163, %164 : vector<16x12xf32>
    %cst_48 = arith.constant dense<0.000000e+00> : vector<12xf32>
    %166 = vector.multi_reduction <add>, %165, %cst_48 [0] : vector<16x12xf32> to vector<12xf32>
    %167 = vector.shape_cast %166 : vector<12xf32> to vector<1x12xf32>
    %168 = vector.broadcast %8 : vector<1x1xf32> to vector<1x12xf32>
    %169 = arith.addf %167, %168 : vector<1x12xf32>
    %170 = arith.mulf %169, %96 : vector<1x12xf32>
    %c1_49 = arith.constant 1 : index
    %c0_50 = arith.constant 0 : index
    %c0_51 = arith.constant 0 : index
    %171 = vector.load %arg6[%c1_49, %c0_50, %c0_51] : memref<2x1x12xf32, #tpu.memory_space<vmem>>, vector<1x1x12xf32>
    %172 = vector.shape_cast %171 : vector<1x1x12xf32> to vector<1x12xf32>
    %173 = vector.shape_cast %170 : vector<1x12xf32> to vector<1x1x12xf32>
    tpu.vector_store %arg6[%c1_49, %c0_50, %c0_51], %173 {strides = array<i32>} : memref<2x1x12xf32, #tpu.memory_space<vmem>>, vector<1x1x12xf32>,
    return
  }
  func.func @transform_0(%arg0: i32) -> (i32, i32, i32) {
    %c0_i32 = arith.constant 0 : i32
    %c0_i32_0 = arith.constant 0 : i32
    %c0_i32_1 = arith.constant 0 : i32
    return %arg0, %c0_i32, %c0_i32_0 : i32, i32, i32
  }
  func.func @transform_1(%arg0: i32) -> (i32, i32, i32) {
    %c0_i32 = arith.constant 0 : i32
    %c0_i32_0 = arith.constant 0 : i32
    %c0_i32_1 = arith.constant 0 : i32
    return %arg0, %c0_i32, %c0_i32_0 : i32, i32, i32
  }
  func.func @transform_2(%arg0: i32) -> (i32, i32) {
    %c0_i32 = arith.constant 0 : i32
    %c0_i32_0 = arith.constant 0 : i32
    %c0_i32_1 = arith.constant 0 : i32
    return %c0_i32, %c0_i32_0 : i32, i32
  }
  func.func @transform_3(%arg0: i32) -> (i32, i32) {
    %c0_i32 = arith.constant 0 : i32
    %c0_i32_0 = arith.constant 0 : i32
    %c0_i32_1 = arith.constant 0 : i32
    return %c0_i32, %c0_i32_0 : i32, i32
  }
  func.func @transform_4(%arg0: i32) -> (i32, i32) {
    %c0_i32 = arith.constant 0 : i32
    %c0_i32_0 = arith.constant 0 : i32
    %c0_i32_1 = arith.constant 0 : i32
    return %c0_i32, %c0_i32_0 : i32, i32
  }
  func.func @transform_5(%arg0: i32) -> (i32, i32, i32) {
    %c0_i32 = arith.constant 0 : i32
    %c0_i32_0 = arith.constant 0 : i32
    %c0_i32_1 = arith.constant 0 : i32
    return %arg0, %c0_i32, %c0_i32_0 : i32, i32, i32
  }
}

</mosaic_0001>

<bundles_post_ra>
// kernel: tpu_custom_call.1
= control target key start
LH: loop header
LB: loop body
LE: loop exit
PB: predicated region body
PF: predicated region fallthrough
CT: control target
= control target key end

     0   :  { %10 = vsyncpa [#allocation3], 0  ;;  %s878_s0 = inlined_call_operand.vmem [shape: f32[2,8,14], index: 0, kind: input, shape index: {}]   ;;  %s879_s1 = inlined_call_operand.vmem [shape: f32[2,1,12], index: 1, kind: input, shape index: {}]   ;;  %s880_s2 = inlined_call_operand.vmem [shape: f32[16,8], index: 2, kind: input, shape index: {}]   ;;  %s881_s3 = inlined_call_operand.hbm [shape: f32[16,24], index: 3, kind: input, shape index: {}]   ;;  %s882_s4 = inlined_call_operand.hbm [shape: f32[16,48], index: 4, kind: input, shape index: {}]   ;;  %s883_s5 = inlined_call_operand.hbm [shape: f32[2,1,12], index: 5, kind: output, shape index: {}]  }
   0x1   :  { %11 = vsyncpa [#allocation6], 0 }
   0x2   :  { %12 = vsyncpa [#allocation4], 0  ;;  %s23_s20 = sshll.u32 %s881_s3, 4  ;;  %s702_s21 = smov [#allocation2]   ;;  %s24_s20 = int_to_ptr.hbm [resolvable:$true] %s23_s20 }
   0x3   :  { %s25_s22 = sshll.u32 %s702_s21, 4  ;;  %s36_s25 = sshll.u32 %s882_s4, 4  ;;  %s26_s22 = int_to_ptr.vmem [resolvable:$true] %s25_s22  ;;  %s37_s25 = int_to_ptr.hbm [resolvable:$true] %s36_s25 }
   0x4   :  { %s703_s26 = smov 128   ;;  %s704_s27 = smov 8  }
   0x5   :  { %31 = dma.hbm_to_vmem [thread:$0]  %s24_s20, 256, %s26_s22, [#allocation3], %s703_s26, %s703_s26, %s704_s27  }
   0x6   :  { %s705_s28 = smov [#allocation5]  }
   0x7   :  { %s38_s29 = sshll.u32 %s705_s28, 4  ;;  %s39_s29 = int_to_ptr.vmem [resolvable:$true] %s38_s29 }
   0x8   :  { %44 = dma.hbm_to_vmem [thread:$0]  %s37_s25, 256, %s39_s29, [#allocation6], %s703_s26, %s703_s26, %s704_s27  }
   0x9   :  { %696 = dma.done.wait [#allocation3], 256  }
   0xa   :  { %697 = vsyncadd [#allocation3], 4294967040 }
   0xb   :  { %698 = dma.done.wait [#allocation6], 256  }
   0xc   :  { %699 = vsyncadd [#allocation6], 4294967040  ;;  %v551_v0 = vld [vmem:[%s878_s0 + $0x8] sm:$0xff]  ;;  %v59_v1 = vld [vmem:[%s878_s0] sm:$0xff]  ;;  %s706_s4 = smov 126   ;;  %s707_s8 = smov 127  }
   0xd   :  { %342 = vrot.lane.b32.xlu0 %v551_v0, %s706_s4  ;;  %65 = vrot.lane.b32.xlu1 %v59_v1, %s706_s4  ;;  %v769_v2 = vld [vmem:[%s880_s2] sm:$0xff]  ;;  %v708_v3 = vmov 0   ;;  %v709_v4 = vmov 1   ;;  %v776_v5 = vld [vmem:[%s880_s2 + $0x8] sm:$0xff]  ;;  %v710_v6 = vmov 2   ;;  %vm78_vm0 = vcmask 195584  }
   0xe   :  { %577 = vset.pattern.permute.xlu2 %v708_v3  ;;  %579 = vset.pattern.permute.xlu1 %v709_v4  ;;  %v55_v11 = vld [vmem:[#allocation2] sm:$0xff]  ;;  %v56_v12 = vld [vmem:[#allocation2 + $0x8] sm:$0xff]  ;;  %v711_v15 = vmov 16.0   ;;  %vm110_vm1 = vcmask 97280   ;;  %s712_s15 = smov 1   ;;  %vm188_vm9 = vcmask 7168  }
   0xf   :  { %70 = vperm.xlu2 %577, %v769_v2   ;;  %578 = vset.pattern.permute.xlu0 %v709_v4  ;;  %614 = vrcp.f32 %v711_v15  ;;  %vm191_vm10 = vcmask 105472   ;;  %vm216_vm11 = vcmask 392192   ;;  %s718_s18 = smov [#allocation7]   ;;  %s531_s24 = sshll.u32 %s883_s5, 4  ;;  %s532_s24 = int_to_ptr.hbm [resolvable:$true] %s531_s24 }
  0x10   :  { %s529_s19 = sshll.u32 %s718_s18, 4  ;;  %s719_s25 = smov 16   ;;  %s530_s19 = int_to_ptr.vmem [resolvable:$true] %s529_s19 }
  0x15   :  { %339 = vrot.lane.b32.xlu0 %v551_v0, %s707_s8  ;;  %62 = vrot.lane.b32.xlu1 %v59_v1, %s707_s8  ;;  %v615_v17 = vpop.eup %614 }
  0x16   :  { %v121_v23 = vmul.f32 16.0, %v615_v17  ;;  %vm125_vm2 = vweird.f32 %v615_v17 }
  0x17   :  { %75 = vperm.xlu2 %577, %v776_v5  }
  0x18   :  { %v122_v28 = vsub.f32 1.0, %v121_v23 }
  0x1a   :  { %v123_v34 = vmul.f32 %v615_v17, %v122_v28 }
  0x1c   :  { %v124_v41 = vadd.f32 %v615_v17, %v123_v34 }
  0x1d   :  { %156 = vperm.xlu1 %579, %v769_v2   ;;  %160 = vperm.xlu0 %578, %v776_v5  }
  0x1e   :  { %v786_v46 = vsel %vm125_vm2, %v615_v17, %v124_v41 }
  0x1f   :  { %580 = vset.pattern.permute.xlu2 %v710_v6 }
  0x20   :  { %170 = vperm.xlu2 %580, %v776_v5  }
  0x25   :  { %581 = vset.pattern.permute.xlu1 %v710_v6 }
  0x26   :  { %166 = vperm.xlu1 %581, %v769_v2  }
  0x69   :  { %v71_v13 = vpop.permute.xlu2 %70 }
  0x71   :  { %v76_v19 = vpop.permute.xlu2 %75 }
  0x7f   :  { %v343_v7 = vpop.permute.xlu0 %342  ;;  %v66_v8 = vpop.permute.xlu1 %65 }
  0x80   :  { %358 = vmatpush.msra.mxu2 %v343_v7  ;;  %98 = vmatpush.msra.mxu0 %v66_v8 }
  0x87   :  { %v340_v9 = vpop.permute.xlu0 %339  ;;  %v63_v10 = vpop.permute.xlu1 %62 }
  0x88   :  { %99 = vmatpush.msra.mxu0 %v63_v10  ;;  %359 = vmatpush.msra.mxu2 %v340_v9 }
  0x8a   :  { %100 = vmatpush.msra.mxu0 %v59_v1  ;;  %360 = vmatpush.msra.mxu2 %v551_v0 }
  0x8b   :  { %545 = vmatmul.msk.f32.vlgmr.msra.gmra.mxu0 %vm78_vm0, %v55_v11  ;;  %553 = vmatmul.msk.f32.vlgmr.msra.gmra.mxu2 %vm78_vm0, %v55_v11 }
  0x8f   :  { %v161_v34 = vpop.permute.xlu0 %160 }
  0x93   :  { %546 = vmatmul.msk.f32.gmra.mxu0 %vm78_vm0, %v56_v12  ;;  %554 = vmatmul.msk.f32.gmra.mxu2 %vm78_vm0, %v56_v12 }
 0x108   :  { %v102_v14 = vpop.f32.mrf.mxu0 }
 0x109   :  { %v103_v16 = vadd.f32 %v102_v14, %v71_v13 }
 0x10b   :  { %v108_v21 = vmax.f32 %v103_v16, 0.0 }
 0x10d   :  { %v111_v26 = vsel %vm110_vm1, %v108_v21, 0.0 }
 0x10e   :  { %v362_v18 = vpop.f32.mrf.mxu2 }
 0x10f   :  { %v363_v24 = vadd.f32 %v362_v18, %v71_v13 }
 0x110   :  { %v105_v20 = vpop.f32.mrf.mxu0 }
 0x111   :  { %v106_v22 = vadd.f32 %v105_v20, %v76_v19  ;;  %v368_v31 = vmax.f32 %v363_v24, 0.0 }
 0x113   :  { %v109_v25 = vmax.f32 %v106_v22, 0.0  ;;  %v370_v37 = vsel %vm110_vm1, %v368_v31, 0.0 }
 0x115   :  { %v112_v27 = vsel %vm110_vm1, %v109_v25, 0.0 }
 0x116   :  { %v113_v29 = vadd.f32 %v112_v27, %v111_v26  ;;  %v365_v30 = vpop.f32.mrf.mxu2 }
 0x117   :  { %v366_v32 = vadd.f32 %v365_v30, %v76_v19 }
 0x118   :  { %v114_v33 = vrot.slane %v113_v29, 4 }
 0x119   :  { %v369_v35 = vmax.f32 %v366_v32, 0.0 }
 0x11a   :  { %v115_v36 = vadd.f32 %v114_v33, %v113_v29 }
 0x11b   :  { %v371_v38 = vsel %vm110_vm1, %v369_v35, 0.0 }
 0x11c   :  { %v116_v39 = vrot.slane %v115_v36, 2  ;;  %v372_v40 = vadd.f32 %v371_v38, %v370_v37  ;;  %v171_v37 = vpop.permute.xlu2 %170 }
 0x11e   :  { %v117_v42 = vadd.f32 %v116_v39, %v115_v36  ;;  %v373_v43 = vrot.slane %v372_v40, 4  ;;  %v803_v39 = vld [vmem:[%s879_s1] ss:$0 sm:$0xff] }
 0x120   :  { %v118_v44 = vrot.slane %v117_v42, 1  ;;  %v374_v45 = vadd.f32 %v373_v43, %v372_v40 }
 0x122   :  { %v119_v47 = vadd.f32 %v118_v44, %v117_v42  ;;  %v375_v48 = vrot.slane %v374_v45, 2 }
 0x124   :  { %v127_v49 = vmul.f32 %v786_v46, %v119_v47  ;;  %v376_v50 = vadd.f32 %v375_v48, %v374_v45 }
 0x126   :  { %v129_v51 = vsub.f32 %v109_v25, %v127_v49  ;;  %v377_v52 = vrot.slane %v376_v50, 1  ;;  %v789_v53 = vsub.f32 %v108_v21, %v127_v49 }
 0x128   :  { %v131_v54 = vmul.f32 %v129_v51, %v129_v51  ;;  %v378_v55 = vadd.f32 %v377_v52, %v376_v50  ;;  %v130_v56 = vmul.f32 %v789_v53, %v789_v53  ;;  %v810_v50 = vld [vmem:[%s879_s1 + $0x1] ss:$0 sm:$0xff] }
 0x12a   :  { %v133_v57 = vsel %vm110_vm1, %v131_v54, 0.0  ;;  %v379_v58 = vmul.f32 %v378_v55, %v786_v46  ;;  %v132_v59 = vsel %vm110_vm1, %v130_v56, 0.0 }
 0x12b   :  { %v134_v60 = vadd.f32 %v133_v57, %v132_v59 }
 0x12c   :  { %v381_v61 = vsub.f32 %v369_v35, %v379_v58  ;;  %v380_v62 = vsub.f32 %v368_v31, %v379_v58  ;;  %v157_v31 = vpop.permute.xlu1 %156 }
 0x12d   :  { %v135_v63 = vrot.slane %v134_v60, 4 }
 0x12e   :  { %v383_v0 = vmul.f32 %v381_v61, %v381_v61  ;;  %v382_v1 = vmul.f32 %v380_v62, %v380_v62 }
 0x12f   :  { %v136_v3 = vadd.f32 %v135_v63, %v134_v60 }
 0x130   :  { %v385_v4 = vsel %vm110_vm1, %v383_v0, 0.0  ;;  %v384_v6 = vsel %vm110_vm1, %v382_v1, 0.0 }
 0x131   :  { %v137_v7 = vrot.slane %v136_v3, 2  ;;  %v386_v8 = vadd.f32 %v385_v4, %v384_v6 }
 0x133   :  { %v138_v9 = vadd.f32 %v137_v7, %v136_v3  ;;  %v387_v10 = vrot.slane %v386_v8, 4 }
 0x135   :  { %v139_v11 = vrot.slane %v138_v9, 1  ;;  %v388_v12 = vadd.f32 %v387_v10, %v386_v8 }
 0x137   :  { %v140_v13 = vadd.f32 %v139_v11, %v138_v9  ;;  %v389_v14 = vrot.slane %v388_v12, 2 }
 0x139   :  { %v141_v15 = vmul.f32 %v140_v13, %v786_v46  ;;  %v390_v16 = vadd.f32 %v389_v14, %v388_v12  ;;  %v713_v14 = vmov 3  }
 0x13a   :  { %602 = vset.pattern.permute.xlu1 %v713_v14  ;;  %603 = vset.pattern.permute.xlu2 %v713_v14 }
 0x13b   :  { %v142_v17 = vadd.f32 0.0001, %v141_v15  ;;  %v391_v18 = vrot.slane %v390_v16, 1  ;;  %v714_v15 = vmov 4  }
 0x13c   :  { %604 = vset.pattern.permute.xlu0 %v714_v15 }
 0x13d   :  { %616 = vrsqrt.f32 %v142_v17  ;;  %v392_v19 = vadd.f32 %v391_v18, %v390_v16  ;;  %vm149_vm4 = vweird.f32 %v142_v17 }
 0x13f   :  { %v393_v20 = vmul.f32 %v392_v19, %v786_v46 }
 0x141   :  { %v394_v21 = vadd.f32 0.0001, %v393_v20  ;;  %v715_v20 = vmov 5  }
 0x143   :  { %v617_v22 = vpop.eup %616  ;;  %618 = vrsqrt.f32 %v394_v21  ;;  %vm401_vm7 = vweird.f32 %v394_v21 }
 0x144   :  { %v144_v23 = vmul.f32 %v617_v22, %v142_v17  ;;  %vm150_vm3 = vweird.f32 %v617_v22 }
 0x145   :  { %vm151_vm5 = vmor %vm149_vm4, %vm150_vm3 }
 0x146   :  { %v145_v24 = vmul.f32 %v617_v22, %v144_v23 }
 0x148   :  { %v146_v25 = vmul.f32 0.5, %v145_v24 }
 0x149   :  { %v619_v26 = vpop.eup %618 }
 0x14a   :  { %v147_v27 = vsub.f32 1.5, %v146_v25  ;;  %v396_v28 = vmul.f32 %v619_v26, %v394_v21  ;;  %vm402_vm6 = vweird.f32 %v619_v26 }
 0x14b   :  { %vm403_vm8 = vmor %vm401_vm7, %vm402_vm6 }
 0x14c   :  { %v148_v29 = vmul.f32 %v617_v22, %v147_v27  ;;  %v397_v30 = vmul.f32 %v619_v26, %v396_v28  ;;  %v57_v27 = vld [vmem:[#allocation5] sm:$0xff]  ;;  %v717_v28 = vmov 7  }
 0x14e   :  { %v152_v32 = vsel %vm151_vm5, %v617_v22, %v148_v29  ;;  %v398_v33 = vmul.f32 0.5, %v397_v30  ;;  %v716_v22 = vmov 6   ;;  %v58_v29 = vld [vmem:[#allocation5 + $0x8] sm:$0xff] }
 0x14f   :  { %v154_v35 = vmul.f32 %v152_v32, %v129_v51  ;;  %v153_v47 = vmul.f32 %v152_v32, %v789_v53  ;;  %v167_v51 = vpop.permute.xlu1 %166 }
 0x150   :  { %v399_v36 = vsub.f32 1.5, %v398_v33 }
 0x151   :  { %v164_v38 = vmul.f32 %v161_v34, %v154_v35  ;;  %v163_v55 = vmul.f32 %v157_v31, %v153_v47 }
 0x152   :  { %v400_v40 = vmul.f32 %v619_v26, %v399_v36 }
 0x153   :  { %v174_v41 = vadd.f32 %v171_v37, %v164_v38  ;;  %v173_v53 = vadd.f32 %v167_v51, %v163_v55 }
 0x154   :  { %v404_v42 = vsel %vm403_vm8, %v619_v26, %v400_v40 }
 0x155   :  { %v405_v43 = vmul.f32 %v404_v42, %v380_v62  ;;  %v406_v44 = vmul.f32 %v404_v42, %v381_v61  ;;  %v179_v45 = vmul.f32 %v803_v39, %v174_v41  ;;  %v178_v58 = vmul.f32 %v803_v39, %v173_v53 }
 0x157   :  { %v407_v48 = vmul.f32 %v405_v43, %v157_v31  ;;  %v408_v49 = vmul.f32 %v406_v44, %v161_v34  ;;  %184 = vrot.lane.b32.xlu1 %v179_v45, %s712_s15 }
 0x159   :  { %v409_v52 = vadd.f32 %v407_v48, %v167_v51  ;;  %v410_v54 = vadd.f32 %v408_v49, %v171_v37 }
 0x15b   :  { %v414_v56 = vmul.f32 %v810_v50, %v409_v52  ;;  %v415_v57 = vmul.f32 %v810_v50, %v410_v54 }
 0x15d   :  { %418 = vrot.lane.b32.xlu0 %v414_v56, %s712_s15  ;;  %420 = vrot.lane.b32.xlu2 %v415_v57, %s712_s15 }
 0x165   :  { %182 = vrot.lane.b32.xlu2 %v178_v58, %s712_s15 }
 0x1b7   :  { %v421_v59 = vpop.permute.xlu2 %420 }
 0x1b8   :  { %v425_v4 = vsel %vm188_vm9, 0.0, %v421_v59 }
 0x1b9   :  { %v427_v8 = vsel %vm191_vm10, %v425_v4, 0.0 }
 0x1bf   :  { %v183_v60 = vpop.permute.xlu2 %182 }
 0x1c0   :  { %v819_v61 = vsel %vm188_vm9, 0.0, %v183_v60 }
 0x1c1   :  { %v192_v0 = vsel %vm191_vm10, %v819_v61, 0.0 }
 0x1c9   :  { %v185_v62 = vpop.permute.xlu1 %184 }
 0x1ca   :  { %v190_v63 = vsel %vm188_vm9, 0.0, %v185_v62 }
 0x1cb   :  { %v193_v1 = vsel %vm191_vm10, %v190_v63, 0.0 }
 0x1cc   :  { %v592_v3 = vpack.i.bf16 %v192_v0, %v193_v1 }
 0x1ce   :  { %593 = vrot.lane.b32.xlu2 %v592_v3, %s706_s4 }
 0x1cf   :  { %v419_v6 = vpop.permute.xlu0 %418 }
 0x1d0   :  { %v424_v7 = vsel %vm188_vm9, 0.0, %v419_v6 }
 0x1d1   :  { %v426_v9 = vsel %vm191_vm10, %v424_v7, 0.0 }
 0x1d2   :  { %v587_v10 = vpack.i.bf16 %v426_v9, %v427_v8 }
 0x1d4   :  { %588 = vrot.lane.b32.xlu1 %v587_v10, %s707_s8  ;;  %583 = vrot.lane.b32.xlu0 %v587_v10, %s706_s4 }
 0x1d6   :  { %213 = vperm.xlu2 %603, %v776_v5  }
 0x1dc   :  { %598 = vrot.lane.b32.xlu0 %v592_v3, %s707_s8  ;;  %209 = vperm.xlu1 %602, %v769_v2  }
 0x1de   :  { %606 = vset.pattern.permute.xlu2 %v715_v20 }
 0x1df   :  { %296 = vperm.xlu2 %606, %v769_v2  }
 0x1e4   :  { %286 = vperm.xlu0 %604, %v769_v2   ;;  %605 = vset.pattern.permute.xlu1 %v714_v15 }
 0x1e5   :  { %290 = vperm.xlu1 %605, %v776_v5  }
 0x1e7   :  { %608 = vset.pattern.permute.xlu2 %v716_v22 }
 0x1e8   :  { %308 = vperm.xlu2 %608, %v769_v2  }
 0x1ec   :  { %609 = vset.pattern.permute.xlu0 %v716_v22 }
 0x1ed   :  { %312 = vperm.xlu0 %609, %v776_v5   ;;  %607 = vset.pattern.permute.xlu1 %v715_v20 }
 0x1ee   :  { %300 = vperm.xlu1 %607, %v776_v5  }
 0x1f5   :  { %611 = vset.pattern.permute.xlu0 %v717_v28 }
 0x1f6   :  { %610 = vset.pattern.permute.xlu1 %v717_v28 }
 0x1f7   :  { %327 = vperm.xlu1 %610, %v769_v2  }
 0x228   :  { %v594_v11 = vpop.permute.xlu2 %593 }
 0x229   :  { %v595_v12 = vunpack.i.l.bf16 %v594_v11  ;;  %v596_v13 = vunpack.i.h.bf16 %v594_v11 }
 0x22b   :  { %233 = vmatpush.msra.mxu1 %v595_v12 }
 0x22d   :  { %234 = vmatpush.msra.mxu1 %v596_v13 }
 0x230   :  { %v214_v33 = vpop.permute.xlu2 %213 }
 0x246   :  { %v584_v16 = vpop.permute.xlu0 %583  ;;  %v589_v18 = vpop.permute.xlu1 %588 }
 0x247   :  { %v585_v17 = vunpack.i.l.bf16 %v584_v16  ;;  %v586_v19 = vunpack.i.h.bf16 %v584_v16  ;;  %v590_v21 = vunpack.i.l.bf16 %v589_v18  ;;  %v591_v23 = vunpack.i.h.bf16 %v589_v18 }
 0x249   :  { %452 = vmatpush.msra.mxu3 %v585_v17 }
 0x24b   :  { %453 = vmatpush.msra.mxu3 %v586_v19 }
 0x24d   :  { %454 = vmatpush.msra.mxu3 %v590_v21 }
 0x24e   :  { %v599_v24 = vpop.permute.xlu0 %598  ;;  %v210_v5 = vpop.permute.xlu1 %209 }
 0x24f   :  { %455 = vmatpush.msra.mxu3 %v591_v23  ;;  %v600_v25 = vunpack.i.l.bf16 %v599_v24  ;;  %v601_v26 = vunpack.i.h.bf16 %v599_v24 }
 0x251   :  { %235 = vmatpush.msra.mxu1 %v600_v25  ;;  %555 = vmatpush.msk.msra.mxu3 %vm191_vm10, %v425_v4 }
 0x253   :  { %236 = vmatpush.msra.mxu1 %v601_v26  ;;  %556 = vmatpush.msk.msra.mxu3 %vm191_vm10, %v424_v7 }
 0x254   :  { %557 = vmatmul.msk.f32.vlgmr.msra.gmra.mxu3 %vm216_vm11, %v57_v27 }
 0x255   :  { %547 = vmatpush.msk.msra.mxu1 %vm191_vm10, %v190_v63 }
 0x257   :  { %548 = vmatpush.msk.msra.mxu1 %vm191_vm10, %v819_v61 }
 0x258   :  { %549 = vmatmul.msk.f32.vlgmr.msra.gmra.mxu1 %vm216_vm11, %v57_v27 }
 0x25c   :  { %558 = vmatmul.msk.f32.gmra.mxu3 %vm216_vm11, %v58_v29 }
 0x260   :  { %550 = vmatmul.msk.f32.gmra.mxu1 %vm216_vm11, %v58_v29 }
 0x2d5   :  { %v240_v30 = vpop.f32.mrf.mxu1 }
 0x2d6   :  { %v241_v32 = vadd.f32 %v240_v30, %v210_v5 }
 0x2d7   :  { %v459_v31 = vpop.f32.mrf.mxu3 }
 0x2d8   :  { %v460_v34 = vadd.f32 %v459_v31, %v210_v5  ;;  %v246_v36 = vmax.f32 %v241_v32, 0.0 }
 0x2da   :  { %v465_v40 = vmax.f32 %v460_v34, 0.0  ;;  %v248_v43 = vsel %vm110_vm1, %v246_v36, 0.0 }
 0x2dc   :  { %v467_v47 = vsel %vm110_vm1, %v465_v40, 0.0 }
 0x2dd   :  { %v243_v35 = vpop.f32.mrf.mxu1 }
 0x2de   :  { %v244_v37 = vadd.f32 %v243_v35, %v214_v33  ;;  %v291_v35 = vpop.permute.xlu1 %290 }
 0x2df   :  { %v462_v38 = vpop.f32.mrf.mxu3 }
 0x2e0   :  { %v247_v41 = vmax.f32 %v244_v37, 0.0  ;;  %v463_v42 = vadd.f32 %v462_v38, %v214_v33 }
 0x2e2   :  { %v249_v44 = vsel %vm110_vm1, %v247_v41, 0.0  ;;  %v466_v2 = vmax.f32 %v463_v42, 0.0 }
 0x2e3   :  { %v250_v45 = vadd.f32 %v249_v44, %v248_v43  ;;  %v287_v43 = vpop.permute.xlu0 %286  ;;  %v297_v44 = vpop.permute.xlu2 %296 }
 0x2e4   :  { %v468_v48 = vsel %vm110_vm1, %v466_v2, 0.0 }
 0x2e5   :  { %v251_v49 = vrot.slane %v250_v45, 4  ;;  %v469_v51 = vadd.f32 %v468_v48, %v467_v47 }
 0x2e7   :  { %v252_v52 = vadd.f32 %v251_v49, %v250_v45  ;;  %v470_v54 = vrot.slane %v469_v51, 4 }
 0x2e9   :  { %v253_v55 = vrot.slane %v252_v52, 2  ;;  %v471_v56 = vadd.f32 %v470_v54, %v469_v51 }
 0x2eb   :  { %v254_v57 = vadd.f32 %v253_v55, %v252_v52  ;;  %v472_v53 = vrot.slane %v471_v56, 2  ;;  %v301_v52 = vpop.permute.xlu1 %300 }
 0x2ed   :  { %v255_v58 = vrot.slane %v254_v57, 1  ;;  %v473_v59 = vadd.f32 %v472_v53, %v471_v56 }
 0x2ef   :  { %v256_v60 = vadd.f32 %v255_v58, %v254_v57  ;;  %v474_v61 = vrot.slane %v473_v59, 1 }
 0x2f1   :  { %v257_v62 = vmul.f32 %v256_v60, %v786_v46  ;;  %v475_v63 = vadd.f32 %v474_v61, %v473_v59  ;;  %v313_v61 = vpop.permute.xlu0 %312 }
 0x2f3   :  { %v258_v0 = vsub.f32 %v246_v36, %v257_v62  ;;  %v259_v1 = vsub.f32 %v247_v41, %v257_v62  ;;  %v476_v3 = vmul.f32 %v475_v63, %v786_v46  ;;  %v309_v62 = vpop.permute.xlu2 %308 }
 0x2f5   :  { %v260_v4 = vmul.f32 %v258_v0, %v258_v0  ;;  %v261_v6 = vmul.f32 %v259_v1, %v259_v1  ;;  %v477_v7 = vsub.f32 %v465_v40, %v476_v3  ;;  %v478_v8 = vsub.f32 %v466_v2, %v476_v3 }
 0x2f7   :  { %v262_v9 = vsel %vm110_vm1, %v260_v4, 0.0  ;;  %v263_v10 = vsel %vm110_vm1, %v261_v6, 0.0  ;;  %v479_v11 = vmul.f32 %v477_v7, %v477_v7  ;;  %v480_v12 = vmul.f32 %v478_v8, %v478_v8 }
 0x2f8   :  { %v264_v13 = vadd.f32 %v263_v10, %v262_v9 }
 0x2f9   :  { %v481_v14 = vsel %vm110_vm1, %v479_v11, 0.0  ;;  %v482_v15 = vsel %vm110_vm1, %v480_v12, 0.0 }
 0x2fa   :  { %v265_v16 = vrot.slane %v264_v13, 4  ;;  %v483_v17 = vadd.f32 %v482_v15, %v481_v14 }
 0x2fc   :  { %v266_v18 = vadd.f32 %v265_v16, %v264_v13  ;;  %v484_v19 = vrot.slane %v483_v17, 4 }
 0x2fe   :  { %v267_v20 = vrot.slane %v266_v18, 2  ;;  %v485_v21 = vadd.f32 %v484_v19, %v483_v17 }
 0x300   :  { %v268_v22 = vadd.f32 %v267_v20, %v266_v18  ;;  %v486_v23 = vrot.slane %v485_v21, 2 }
 0x302   :  { %v269_v24 = vrot.slane %v268_v22, 1  ;;  %v487_v25 = vadd.f32 %v486_v23, %v485_v21 }
 0x304   :  { %v270_v26 = vadd.f32 %v269_v24, %v268_v22  ;;  %v488_v27 = vrot.slane %v487_v25, 1  ;;  %v328_v24 = vpop.permute.xlu1 %327 }
 0x306   :  { %v489_v28 = vadd.f32 %v488_v27, %v487_v25  ;;  %v271_v29 = vmul.f32 %v270_v26, %v786_v46  ;;  %v60_v27 = vld [vmem:[%s879_s1] sm:$0x1] }
 0x308   :  { %v272_v30 = vadd.f32 0.0001, %v271_v29  ;;  %v490_v5 = vmul.f32 %v489_v28, %v786_v46 }
 0x30a   :  { %620 = vrsqrt.f32 %v272_v30  ;;  %v491_v31 = vadd.f32 0.0001, %v490_v5  ;;  %vm279_vm13 = vweird.f32 %v272_v30 }
 0x30c   :  { %622 = vrsqrt.f32 %v491_v31  ;;  %vm498_vm0 = vweird.f32 %v491_v31 }
 0x310   :  { %v621_v32 = vpop.eup %620 }
 0x311   :  { %v274_v33 = vmul.f32 %v621_v32, %v272_v30  ;;  %vm280_vm12 = vweird.f32 %v621_v32  ;;  %v552_v30 = vld [vmem:[%s879_s1 + $0x1] sm:$0x1] }
 0x312   :  { %v623_v34 = vpop.eup %622  ;;  %vm281_vm15 = vmor %vm279_vm13, %vm280_vm12 }
 0x313   :  { %v275_v36 = vmul.f32 %v621_v32, %v274_v33  ;;  %v493_v37 = vmul.f32 %v623_v34, %v491_v31  ;;  %vm499_vm14 = vweird.f32 %v623_v34 }
 0x314   :  { %vm500_vm2 = vmor %vm498_vm0, %vm499_vm14 }
 0x315   :  { %v276_v38 = vmul.f32 0.5, %v275_v36  ;;  %v494_v40 = vmul.f32 %v623_v34, %v493_v37 }
 0x317   :  { %v277_v41 = vsub.f32 1.5, %v276_v38  ;;  %v495_v42 = vmul.f32 0.5, %v494_v40 }
 0x319   :  { %v278_v2 = vmul.f32 %v621_v32, %v277_v41  ;;  %v496_v45 = vsub.f32 1.5, %v495_v42 }
 0x31b   :  { %v282_v46 = vsel %vm281_vm15, %v621_v32, %v278_v2  ;;  %v497_v47 = vmul.f32 %v623_v34, %v496_v45 }
 0x31c   :  { %v284_v48 = vmul.f32 %v282_v46, %v259_v1  ;;  %v283_v49 = vmul.f32 %v282_v46, %v258_v0 }
 0x31d   :  { %v501_v51 = vsel %vm500_vm2, %v623_v34, %v497_v47 }
 0x31e   :  { %v294_v54 = vmul.f32 %v291_v35, %v284_v48  ;;  %v503_v55 = vmul.f32 %v501_v51, %v478_v8  ;;  %v293_v56 = vmul.f32 %v287_v43, %v283_v49  ;;  %v502_v57 = vmul.f32 %v501_v51, %v477_v7 }
 0x320   :  { %v505_v53 = vmul.f32 %v503_v55, %v291_v35  ;;  %v504_v58 = vmul.f32 %v502_v57, %v287_v43  ;;  %v303_v59 = vadd.f32 %v297_v44, %v293_v56  ;;  %v304_v60 = vadd.f32 %v301_v52, %v294_v54 }
 0x322   :  { %v506_v63 = vadd.f32 %v504_v58, %v297_v44  ;;  %v507_v3 = vadd.f32 %v505_v53, %v301_v52  ;;  %v306_v4 = vmul.f32 %v803_v39, %v304_v60  ;;  %v305_v1 = vmul.f32 %v803_v39, %v303_v59 }
 0x324   :  { %v316_v6 = vmul.f32 %v313_v61, %v306_v4  ;;  %v509_v0 = vmul.f32 %v810_v50, %v507_v3  ;;  %v508_v9 = vmul.f32 %v810_v50, %v506_v63  ;;  %v315_v8 = vmul.f32 %v309_v62, %v305_v1 }
 0x326   :  { %v318_v7 = vsel %vm110_vm1, %v316_v6, 0.0  ;;  %v511_v10 = vmul.f32 %v509_v0, %v313_v61  ;;  %v317_v11 = vsel %vm110_vm1, %v315_v8, 0.0  ;;  %v510_v12 = vmul.f32 %v508_v9, %v309_v62 }
 0x327   :  { %v319_v13 = vadd.f32 %v318_v7, %v317_v11 }
 0x328   :  { %v513_v14 = vsel %vm110_vm1, %v511_v10, 0.0  ;;  %v512_v15 = vsel %vm110_vm1, %v510_v12, 0.0  ;;  %vm332_vm1 = vcmask 90112  }
 0x329   :  { %v320_v16 = vrot.slane %v319_v13, 4  ;;  %v514_v17 = vadd.f32 %v513_v14, %v512_v15 }
 0x32b   :  { %v321_v39 = vadd.f32 %v320_v16, %v319_v13  ;;  %v515_v18 = vrot.slane %v514_v17, 4 }
 0x32d   :  { %v516_v19 = vadd.f32 %v515_v18, %v514_v17  ;;  %v322_v20 = vrot.slane %v321_v39, 2 }
 0x32f   :  { %v323_v21 = vadd.f32 %v322_v20, %v321_v39  ;;  %v517_v50 = vrot.slane %v516_v19, 2 }
 0x331   :  { %v324_v22 = vrot.slane %v323_v21, 1  ;;  %v518_v23 = vadd.f32 %v517_v50, %v516_v19 }
 0x333   :  { %v325_v25 = vadd.f32 %v324_v22, %v323_v21  ;;  %v519_v26 = vrot.slane %v518_v23, 1 }
 0x335   :  { %v330_v28 = vadd.f32 %v328_v24, %v325_v25  ;;  %v520_v29 = vadd.f32 %v519_v26, %v518_v23 }
 0x337   :  { %v331_v5 = vmul.f32 %v330_v28, %v60_v27  ;;  %v521_v31 = vadd.f32 %v520_v29, %v328_v24 }
 0x339   :  { %333 = vst.msk [vmem:[#allocation7] sm:$0x1] %vm332_vm1, %v331_v5  ;;  %v522_v32 = vmul.f32 %v552_v30, %v521_v31 }
 0x33b   :  { %524 = vst.msk [vmem:[#allocation7 + $0x1] sm:$0x1] %vm332_vm1, %v522_v32 }
 0x33c   :  { %537 = dma.vmem_to_hbm [thread:$0]  %s530_s19, 32, %s532_s24, [#allocation4], %s719_s25, %s719_s25, %s712_s15  }
 0x33d   :  { %700 = dma.done.wait [#allocation4], 32  }
 0x33e   :  { %701 = vsyncadd [#allocation4], 4294967264 }
 0x33f   :  { %542 = vsyncpa [#allocation3], 1 }
 0x340   :  { %543 = vsyncpa [#allocation6], 1 }
 0x341   :  { %544 = vsyncpa [#allocation4], 1 }

</bundles_post_ra>
